<compile_context>
chip_gen: v7x
topology: tpu7x:2x2x1
jax: 0.10.0
libtpu: 0.0.40
codegen_flags: <defaults>
</compile_context>

<pallas_src>
import math

import jax
import jax.numpy as jnp
from jax.experimental import pallas as pl
from jax.experimental.pallas import tpu as pltpu


def _plu_kernel(x_ref, w_ref, o_ref):
    # x_ref: (tile_rows, tile_lanes); w_ref: (1, tile_lanes) broadcast over rows.
    x = x_ref[...].astype(jnp.float32)
    w = w_ref[...].astype(jnp.float32)
    o_ref[...] = jnp.where(x >= 0.0, x, x * w).astype(o_ref.dtype)


def plu_forward(x, weight, *, target_block_bytes=2 << 20, lane_cap=4096):
    """PReLU along the last dim of x (== PyTorch prelu(x.mT).mT).

    x: (..., C) float32 or bfloat16; weight: (C,) float32. Returns x.shape, x.dtype.
    """
    orig_shape = x.shape
    C = orig_shape[-1]
    assert weight.shape == (C,)
    rows = math.prod(orig_shape[:-1]) if len(orig_shape) > 1 else 1

    # --- fold rows into the lane axis so the lane dim is a multiple of 128 ----
    k = 128 // math.gcd(C, 128)          # smallest k with (k*C) % 128 == 0
    Cf = k * C                           # folded lane width (multiple of 128)
    rows_pad = pl.cdiv(rows, k) * k      # rows needed for an exact fold

    x2 = x.reshape(rows, C)
    if rows_pad != rows:
        x2 = jnp.pad(x2, ((0, rows_pad - rows), (0, 0)))
    rows_f = rows_pad // k
    x_fold = x2.reshape(rows_f, Cf)                       # free, contiguous reshape
    w_fold = jnp.tile(weight.astype(jnp.float32), k).reshape(1, Cf)

    # --- tiling: lane-dense blocks of ~target_block_bytes --------------------
    tile_lanes = Cf if Cf <= lane_cap else lane_cap       # multiple of 128 (or full C)
    itemsize = jnp.dtype(x.dtype).itemsize
    tile_rows = max(8, (target_block_bytes // (tile_lanes * itemsize)) // 8 * 8)
    tile_rows = min(tile_rows, pl.cdiv(rows_f, 8) * 8)    # don't exceed the data

    grid = (pl.cdiv(rows_f, tile_rows), pl.cdiv(Cf, tile_lanes))

    out_fold = pl.pallas_call(
        _plu_kernel,
        out_shape=jax.ShapeDtypeStruct((rows_f, Cf), x.dtype),
        grid_spec=pltpu.PrefetchScalarGridSpec(
            num_scalar_prefetch=0,
            grid=grid,
            in_specs=[
                pl.BlockSpec((tile_rows, tile_lanes), lambda i, j: (i, j)),
                pl.BlockSpec((1, tile_lanes), lambda i, j: (0, j)),  # weight resident
            ],
            out_specs=pl.BlockSpec((tile_rows, tile_lanes), lambda i, j: (i, j)),
        ),
        compiler_params=pltpu.CompilerParams(
            dimension_semantics=("parallel", "parallel"),
        ),
    )(x_fold, w_fold)

    out2 = out_fold.reshape(rows_pad, C)
    if rows_pad != rows:
        out2 = out2[:rows]
    return out2.reshape(orig_shape)


if __name__ == "__main__":
    # Small shapes consistent with the module: batch=2, seq=16, channels(p)=32.
    B, L, C = 2, 16, 32
    init = 0.25  # nn.PReLU(p, init) fills the weight with `init`

    key = jax.random.PRNGKey(0)
    x = jax.random.normal(key, (B, L, C), dtype=jnp.float32)
    weight = jnp.full((C,), init, dtype=jnp.float32)

    out = plu_forward(x, weight)
    out = jax.block_until_ready(out)

    # Reference check in plain JAX (same semantics as prelu(x.mT).mT).
    ref = jnp.where(x >= 0, x, x * weight[None, None, :])
    assert out.shape == x.shape
    assert out.dtype == x.dtype
    assert jnp.allclose(out, ref, atol=1e-6, rtol=1e-6)

    print("KERNEL_OK")
</pallas_src>

<mosaic_0001>
module attributes {stable_mosaic.version = 11 : i64} {
  func.func @_plu_kernel(%arg0: i32, %arg1: i32, %arg2: memref<8x128xf32, #tpu.memory_space<vmem>>, %arg3: memref<1x128xf32, #tpu.memory_space<vmem>>, %arg4: memref<8x128xf32, #tpu.memory_space<vmem>>) attributes {dimension_semantics = [#tpu.dimension_semantics<parallel>, #tpu.dimension_semantics<parallel>], iteration_bounds = array<i64: 1, 1>, scalar_prefetch = 0 : i64, scratch_operands = 0 : i64, tpu.core_type = #tpu.core_type<tc>, window_params = [{transform_indices = @transform_0, window_bounds = array<i64: 8, 128>}, {transform_indices = @transform_1, window_bounds = array<i64: 1, 128>}, {transform_indices = @transform_2, window_bounds = array<i64: 8, 128>}]} {
    %c0 = arith.constant 0 : index
    %c0_0 = arith.constant 0 : index
    %0 = vector.load %arg2[%c0, %c0_0] : memref<8x128xf32, #tpu.memory_space<vmem>>, vector<8x128xf32>
    %c0_1 = arith.constant 0 : index
    %c0_2 = arith.constant 0 : index
    %1 = vector.load %arg3[%c0_1, %c0_2] : memref<1x128xf32, #tpu.memory_space<vmem>>, vector<1x128xf32>
    %cst = arith.constant 0.000000e+00 : f32
    %2 = vector.broadcast %cst : f32 to vector<8x128xf32>
    %3 = arith.cmpf oge, %0, %2 : vector<8x128xf32>
    %4 = vector.broadcast %1 : vector<1x128xf32> to vector<8x128xf32>
    %5 = arith.mulf %0, %4 : vector<8x128xf32>
    %6 = arith.select %3, %0, %5 : vector<8x128xi1>, vector<8x128xf32>
    %c0_3 = arith.constant 0 : index
    %c0_4 = arith.constant 0 : index
    %7 = vector.load %arg4[%c0_3, %c0_4] : memref<8x128xf32, #tpu.memory_space<vmem>>, vector<8x128xf32>
    tpu.vector_store %arg4[%c0_3, %c0_4], %6 {strides = array<i32>} : memref<8x128xf32, #tpu.memory_space<vmem>>, vector<8x128xf32>,
    return
  }
  func.func @transform_0(%arg0: i32, %arg1: i32) -> (i32, i32) {
    %c0_i32 = arith.constant 0 : i32
    return %arg0, %arg1 : i32, i32
  }
  func.func @transform_1(%arg0: i32, %arg1: i32) -> (i32, i32) {
    %c0_i32 = arith.constant 0 : i32
    %c0_i32_0 = arith.constant 0 : i32
    return %c0_i32, %arg1 : i32, i32
  }
  func.func @transform_2(%arg0: i32, %arg1: i32) -> (i32, i32) {
    %c0_i32 = arith.constant 0 : i32
    return %arg0, %arg1 : i32, i32
  }
}

</mosaic_0001>

<bundles_post_ra>
// kernel: tpu_custom_call.1
= control target key start
LH: loop header
LB: loop body
LE: loop exit
PB: predicated region body
PF: predicated region fallthrough
CT: control target
= control target key end

     0   :  { %7 = vsyncpa [#allocation3], 0  ;;  %s146_s0 = inlined_call_operand.hbm [shape: f32[8,128], index: 0, kind: input, shape index: {}]   ;;  %s147_s1 = inlined_call_operand.vmem [shape: f32[1,128], index: 1, kind: input, shape index: {}]   ;;  %s148_s2 = inlined_call_operand.hbm [shape: f32[8,128], index: 2, kind: output, shape index: {}]  }
   0x1   :  { %8 = vsyncpa [#allocation4], 0  ;;  %s102_s9 = smov [#allocation2]   ;;  %s54_s13 = scalar_lea.hbm %s146_s0, 128 }
   0x2   :  { %s15_s10 = sshll.u32 %s102_s9, 4  ;;  %p55_p0 = scmp.ne.s32.totalorder %s146_s0, %s54_s13  ;;  %s16_s10 = int_to_ptr.vmem [resolvable:$true] %s15_s10 }
   0x3   :  { %p58_p1 = scmp.lt.u32.totalorder %s54_s13, %s146_s0 }
   0x5   :  { %p60_p2 = pnand %p58_p1, %p55_p0 }
   0x7   :  { %63 = shalt.err (!%p60_p2)
}
   0x8   :  { %s64_s18 = scalar_lea.vmem %s16_s10, 128  ;;  %p69_p4 = scmp.lt.s32.totalorder %s16_s10, %s16_s10 }
   0x9   :  { %p65_p3 = scmp.ne.s32.totalorder %s16_s10, %s64_s18  ;;  %p70_p5 = scmp.lt.s32.totalorder %s64_s18, %s64_s18 }
   0xb   :  { %p71_p6 = por %p70_p5, %p69_p4 }
   0xd   :  { %p72_p7 = pnand %p71_p6, %p65_p3 }
   0xf   :  { %75 = shalt.err (!%p72_p7)
}
  0x10   :  { %18 = dma.hbm_to_vmem [thread:$0]  %s146_s0, 128, %s16_s10, [#allocation3]  }
  0x11   :  { %98 = dma.done.wait [#allocation3], 128  }
  0x12   :  { %99 = vsyncadd [#allocation3], 4294967168  ;;  %s103_s21 = smov [#allocation5]   ;;  %v24_v0 = vld [vmem:[#allocation2] sm:$0xff] }
  0x13   :  { %s42_s22 = sshll.u32 %s103_s21, 4  ;;  %v51_v1 = vld [vmem:[%s147_s1] ss:$0 sm:$0xff]  ;;  %vm26_vm0 = vcmp.ge.f32.partialorder %v24_v0, 0.0  ;;  %s43_s22 = int_to_ptr.vmem [resolvable:$true] %s42_s22 }
  0x14   :  { %v33_v2 = vmul.f32 %v51_v1, %v24_v0  ;;  %s76_s25 = scalar_lea.vmem %s43_s22, 128  ;;  %p81_p9 = scmp.lt.s32.totalorder %s43_s22, %s43_s22 }
  0x15   :  { %p77_p8 = scmp.ne.s32.totalorder %s43_s22, %s76_s25  ;;  %p82_p10 = scmp.lt.s32.totalorder %s76_s25, %s76_s25 }
  0x16   :  { %v34_v3 = vsel %vm26_vm0, %v24_v0, %v33_v2 }
  0x17   :  { %35 = vst [vmem:[#allocation5] sm:$0xff] %v34_v3  ;;  %p83_p11 = por %p82_p10, %p81_p9 }
  0x19   :  { %p84_p12 = pnand %p83_p11, %p77_p8 }
  0x1b   :  { %87 = shalt.err (!%p84_p12)
}
  0x1c   :  { %s88_s27 = scalar_lea.hbm %s148_s2, 128 }
  0x1d   :  { %p89_p13 = scmp.ne.s32.totalorder %s148_s2, %s88_s27  ;;  %p92_p0 = scmp.lt.u32.totalorder %s88_s27, %s148_s2 }
  0x1f   :  { %p94_p1 = pnand %p92_p0, %p89_p13 }
  0x21   :  { %97 = shalt.err (!%p94_p1)
}
  0x22   :  { %45 = dma.vmem_to_hbm [thread:$0]  %s43_s22, 128, %s148_s2, [#allocation4]  }
  0x23   :  { %100 = dma.done.wait [#allocation4], 128  }
  0x24   :  { %101 = vsyncadd [#allocation4], 4294967168 }
  0x25   :  { %49 = vsyncpa [#allocation3], 1 }
  0x26   :  { %50 = vsyncpa [#allocation4], 1 }

</bundles_post_ra>
